<compile_context>
chip_gen: v5e
topology: v5e:2x2
jax: 0.10.0
libtpu: 0.0.40
codegen_flags: <defaults>
</compile_context>

<pallas_src>
import functools

import jax
import jax.numpy as jnp
from jax.experimental import pallas as pl
from jax.experimental.pallas import tpu as pltpu


def _round_up(x, m):
    return ((x + m - 1) // m) * m


def _text_proj_kernel(cls_ref, w1_ref, w2_ref, gamma_ref, beta_ref, o_ref):
    # cls_ref:   [TB, E] f32   (CLS-token activations for this batch tile)
    # w1_ref:    [E, D]  bf16  (resident across the whole grid)
    # w2_ref:    [D, D]  bf16  (resident across the whole grid)
    # gamma_ref: [1, D]  f32,  beta_ref: [1, D] f32
    # o_ref:     [TB, D] f32 (or bf16)
    cls = cls_ref[...]

    # Projection.linear1 (no bias): bf16 MXU operands, f32 accumulation.
    embed1 = jnp.dot(cls.astype(jnp.bfloat16), w1_ref[...],
                     preferred_element_type=jnp.float32)            # [TB, D] f32

    # F.gelu (exact, erf-based — PyTorch default), kept in f32 (v5e has no
    # bf16 VPU/EUP path).  Tanh approximation would be cheaper if allowed.
    g = 0.5 * embed1 * (1.0 + jax.lax.erf(embed1 * (1.0 / jnp.sqrt(2.0))))

    # Projection.linear2 (no bias); Dropout(p) is identity in eval mode.
    embed2 = jnp.dot(g.astype(jnp.bfloat16), w2_ref[...],
                     preferred_element_type=jnp.float32)            # [TB, D] f32

    s = embed1 + embed2                                             # residual

    # LayerNorm over the last dim, eps=1e-5 (biased variance), f32.
    # One-pass statistics: both reductions issue back-to-back on the XLU.
    d_inv = 1.0 / s.shape[-1]
    mean = jnp.sum(s, axis=-1, keepdims=True) * d_inv
    mean_sq = jnp.sum(s * s, axis=-1, keepdims=True) * d_inv
    var = jnp.maximum(mean_sq - mean * mean, 0.0)
    ln = (s - mean) * jax.lax.rsqrt(var + 1e-5)
    ln = ln * gamma_ref[...] + beta_ref[...]

    # L2 normalize: multiply by rsqrt (EUP slot) instead of a VALU divide.
    # 1e-12 guards the (degenerate) all-zero row against inf/NaN.
    inv_norm = jax.lax.rsqrt(jnp.sum(ln * ln, axis=-1, keepdims=True) + 1e-12)
    o_ref[...] = (ln * inv_norm).astype(o_ref.dtype)


@functools.partial(jax.jit, static_argnames=("max_tb", "out_dtype"))
def text_encoder_forward(hidden_states, w1_bf16, w2_bf16, gamma, beta, *,
                         max_tb=1024, out_dtype=jnp.float32):
    """hidden_states: [B, S, E] f32 (synthetic base-model output).
       w1_bf16: [E, D] bf16, w2_bf16: [D, D] bf16 (pre-cast, cached by caller).
       gamma/beta: [1, D] f32.  Returns [B, D] in `out_dtype`."""
    B, S, E = hidden_states.shape
    D = w1_bf16.shape[1]

    # Free (layout-preserving) reshape: the CLS token occupies columns [0, E)
    # of each row, so the BlockSpec below extracts it directly from HBM — the
    # [B, S, E] slab is never sliced in the wrapper nor DMA'd into VMEM.
    hs2d = hidden_states.reshape(B, S * E)

    # `astype` is a no-op for already-bf16 weights (the expected path).
    w1b = w1_bf16.astype(jnp.bfloat16)
    w2b = w2_bf16.astype(jnp.bfloat16)

    # Batch tile: as large as possible (amortize per-step overhead), but with
    # at least 2 grid steps when B >= 16 so both v7x TensorCores get work.
    if B >= 16:
        tb = min(max_tb, _round_up(pl.cdiv(B, 2), 8))
    else:
        tb = B
    grid = (pl.cdiv(B, tb),)

    out_bytes = jnp.dtype(out_dtype).itemsize
    cost = pl.CostEstimate(
        flops=2 * B * E * D + 2 * B * D * D,
        transcendentals=B * D + 2 * B,                 # erf on [B,D] + 2 row rsqrts
        bytes_accessed=(B * E * 4                      # CLS activations (f32)
                        + E * D * 2 + D * D * 2        # resident bf16 weights
                        + 2 * D * 4                    # gamma / beta
                        + B * D * out_bytes),          # output
    )

    # NOTE: at E = D = 128 the resident weights are ~64 KiB; if these dims ever
    # reach production size (>= 2-4k), set vmem_limit_bytes in CompilerParams
    # and single-buffer the constant-index weight BlockSpecs.
    return pl.pallas_call(
        _text_proj_kernel,
        out_shape=jax.ShapeDtypeStruct((B, D), out_dtype),
        grid_spec=pltpu.PrefetchScalarGridSpec(
            num_scalar_prefetch=0,
            grid=grid,
            in_specs=[
                pl.BlockSpec((tb, E), lambda i: (i, 0)),   # CLS columns of hs2d
                pl.BlockSpec((E, D), lambda i: (0, 0)),    # w1 resident
                pl.BlockSpec((D, D), lambda i: (0, 0)),    # w2 resident
                pl.BlockSpec((1, D), lambda i: (0, 0)),    # gamma resident
                pl.BlockSpec((1, D), lambda i: (0, 0)),    # beta resident
            ],
            out_specs=pl.BlockSpec((tb, D), lambda i: (i, 0)),
        ),
        compiler_params=pltpu.CompilerParams(
            # Batch tiles are independent -> shard across both TCs on v7x.
            dimension_semantics=("parallel",)),
        cost_estimate=cost,
    )(hs2d, w1b, w2b, gamma, beta)


if __name__ == "__main__":
    # Small shapes consistent with the module's forward:
    #   base output [B, S, E] -> CLS [B, E] -> Projection -> [B, D]
    # E = D = 128 keeps matmul / store lanes dense; B = 32 gives a 2-step
    # "parallel" grid (exercises the v7x dual-TC path).
    B, S, E, D = 32, 8, 128, 128

    key = jax.random.PRNGKey(0)
    k_x, k_w1, k_w2 = jax.random.split(key, 3)

    # Synthetic base-model hidden states (stand-in for AutoModel output[0]).
    hidden_states = jax.random.normal(k_x, (B, S, E), dtype=jnp.float32)

    # Deterministic parameter init (nn.Linear(E, D, bias=False) etc.),
    # stored already transposed for x @ W.
    w1 = jax.random.normal(k_w1, (E, D), dtype=jnp.float32) * (1.0 / jnp.sqrt(E))
    w2 = jax.random.normal(k_w2, (D, D), dtype=jnp.float32) * (1.0 / jnp.sqrt(D))
    gamma = jnp.ones((1, D), dtype=jnp.float32)   # LayerNorm weight
    beta = jnp.zeros((1, D), dtype=jnp.float32)   # LayerNorm bias

    # Pre-cast once, outside the forward (this lives in model state in
    # production; bf16 operands + f32 accumulation drift ~1e-3 vs pure f32).
    w1_bf16 = w1.astype(jnp.bfloat16)
    w2_bf16 = w2.astype(jnp.bfloat16)

    out = jax.block_until_ready(
        text_encoder_forward(hidden_states, w1_bf16, w2_bf16, gamma, beta))

    # Reference in plain JAX with the same bf16-operand / f32-accumulate dots,
    # to catch semantic drift.
    cls = hidden_states[:, 0, :]
    e1 = jnp.dot(cls.astype(jnp.bfloat16), w1_bf16,
                 preferred_element_type=jnp.float32)
    g = 0.5 * e1 * (1.0 + jax.lax.erf(e1 / jnp.sqrt(2.0)))
    e2 = jnp.dot(g.astype(jnp.bfloat16), w2_bf16,
                 preferred_element_type=jnp.float32)
    s = e1 + e2
    mu = s.mean(-1, keepdims=True)
    var = ((s - mu) ** 2).mean(-1, keepdims=True)
    ln = (s - mu) / jnp.sqrt(var + 1e-5) * gamma + beta
    ref = ln / jnp.linalg.norm(ln, axis=-1, keepdims=True)

    assert out.shape == (B, D)
    assert jnp.allclose(out, ref, atol=2e-3, rtol=2e-3), \
        float(jnp.max(jnp.abs(out - ref)))
    print("KERNEL_OK")
</pallas_src>

<mosaic_0001>
module attributes {stable_mosaic.version = 11 : i64} {
  func.func @_text_proj_kernel(%arg0: i32, %arg1: memref<16x128xf32, #tpu.memory_space<vmem>>, %arg2: memref<128x128xbf16, #tpu.memory_space<vmem>>, %arg3: memref<128x128xbf16, #tpu.memory_space<vmem>>, %arg4: memref<1x128xf32, #tpu.memory_space<vmem>>, %arg5: memref<1x128xf32, #tpu.memory_space<vmem>>, %arg6: memref<16x128xf32, #tpu.memory_space<vmem>>) attributes {dimension_semantics = [#tpu.dimension_semantics<parallel>], iteration_bounds = array<i64: 2>, scalar_prefetch = 0 : i64, scratch_operands = 0 : i64, tpu.core_type = #tpu.core_type<tc>, window_params = [{transform_indices = @transform_0, window_bounds = array<i64: 16, 128>}, {pipeline_mode = #tpu.pipeline_mode<synchronous>, transform_indices = @transform_1, window_bounds = array<i64: 128, 128>}, {pipeline_mode = #tpu.pipeline_mode<synchronous>, transform_indices = @transform_2, window_bounds = array<i64: 128, 128>}, {pipeline_mode = #tpu.pipeline_mode<synchronous>, transform_indices = @transform_3, window_bounds = array<i64: 1, 128>}, {pipeline_mode = #tpu.pipeline_mode<synchronous>, transform_indices = @transform_4, window_bounds = array<i64: 1, 128>}, {transform_indices = @transform_5, window_bounds = array<i64: 16, 128>}]} {
    %c0 = arith.constant 0 : index
    %c0_0 = arith.constant 0 : index
    %0 = vector.load %arg1[%c0, %c0_0] : memref<16x128xf32, #tpu.memory_space<vmem>>, vector<16x128xf32>
    %1 = arith.truncf %0 : vector<16x128xf32> to vector<16x128xbf16>
    %c0_1 = arith.constant 0 : index
    %c0_2 = arith.constant 0 : index
    %2 = vector.load %arg2[%c0_1, %c0_2] : memref<128x128xbf16, #tpu.memory_space<vmem>>, vector<128x128xbf16>
    %cst = arith.constant dense<0.000000e+00> : vector<16x128xf32>
    %3 = tpu.matmul %1, %2, %cst {dimension_numbers = #tpu.dot_dimension_numbers<[1], [0], [0], [1], [0, 0, 1, 1], [], []>} : vector<16x128xbf16>, vector<128x128xbf16>, vector<16x128xf32> -> vector<16x128xf32>
    %cst_3 = arith.constant 5.000000e-01 : f32
    %4 = vector.broadcast %cst_3 : f32 to vector<16x128xf32>
    %5 = arith.mulf %4, %3 : vector<16x128xf32>
    %cst_4 = arith.constant 2.000000e+00 : f32
    %6 = math.sqrt %cst_4 : f32
    %cst_5 = arith.constant 1.000000e+00 : f32
    %7 = arith.divf %cst_5, %6 : f32
    %8 = vector.broadcast %7 : f32 to vector<16x128xf32>
    %9 = arith.mulf %3, %8 : vector<16x128xf32>
    %10 = math.erf %9 : vector<16x128xf32>
    %cst_6 = arith.constant 1.000000e+00 : f32
    %11 = vector.broadcast %cst_6 : f32 to vector<16x128xf32>
    %12 = arith.addf %11, %10 : vector<16x128xf32>
    %13 = arith.mulf %5, %12 : vector<16x128xf32>
    %14 = arith.truncf %13 : vector<16x128xf32> to vector<16x128xbf16>
    %c0_7 = arith.constant 0 : index
    %c0_8 = arith.constant 0 : index
    %15 = vector.load %arg3[%c0_7, %c0_8] : memref<128x128xbf16, #tpu.memory_space<vmem>>, vector<128x128xbf16>
    %cst_9 = arith.constant dense<0.000000e+00> : vector<16x128xf32>
    %16 = tpu.matmul %14, %15, %cst_9 {dimension_numbers = #tpu.dot_dimension_numbers<[1], [0], [0], [1], [0, 0, 1, 1], [], []>} : vector<16x128xbf16>, vector<128x128xbf16>, vector<16x128xf32> -> vector<16x128xf32>
    %17 = arith.addf %3, %16 : vector<16x128xf32>
    %cst_10 = arith.constant dense<0.000000e+00> : vector<16xf32>
    %18 = vector.multi_reduction <add>, %17, %cst_10 [1] : vector<16x128xf32> to vector<16xf32>
    %19 = vector.shape_cast %18 : vector<16xf32> to vector<16x1xf32>
    %cst_11 = arith.constant 7.812500e-03 : f32
    %20 = vector.broadcast %cst_11 : f32 to vector<16x1xf32>
    %21 = arith.mulf %19, %20 : vector<16x1xf32>
    %22 = arith.mulf %17, %17 : vector<16x128xf32>
    %cst_12 = arith.constant dense<0.000000e+00> : vector<16xf32>
    %23 = vector.multi_reduction <add>, %22, %cst_12 [1] : vector<16x128xf32> to vector<16xf32>
    %24 = vector.shape_cast %23 : vector<16xf32> to vector<16x1xf32>
    %cst_13 = arith.constant 7.812500e-03 : f32
    %25 = vector.broadcast %cst_13 : f32 to vector<16x1xf32>
    %26 = arith.mulf %24, %25 : vector<16x1xf32>
    %27 = arith.mulf %21, %21 : vector<16x1xf32>
    %28 = arith.subf %26, %27 : vector<16x1xf32>
    %cst_14 = arith.constant 0.000000e+00 : f32
    %29 = vector.broadcast %cst_14 : f32 to vector<16x1xf32>
    %30 = arith.maximumf %28, %29 : vector<16x1xf32>
    %31 = vector.broadcast %21 : vector<16x1xf32> to vector<16x128xf32>
    %32 = arith.subf %17, %31 : vector<16x128xf32>
    %cst_15 = arith.constant 9.99999974E-6 : f32
    %33 = vector.broadcast %cst_15 : f32 to vector<16x1xf32>
    %34 = arith.addf %30, %33 : vector<16x1xf32>
    %35 = math.rsqrt %34 : vector<16x1xf32>
    %36 = vector.broadcast %35 : vector<16x1xf32> to vector<16x128xf32>
    %37 = arith.mulf %32, %36 : vector<16x128xf32>
    %c0_16 = arith.constant 0 : index
    %c0_17 = arith.constant 0 : index
    %38 = vector.load %arg4[%c0_16, %c0_17] : memref<1x128xf32, #tpu.memory_space<vmem>>, vector<1x128xf32>
    %39 = vector.broadcast %38 : vector<1x128xf32> to vector<16x128xf32>
    %40 = arith.mulf %37, %39 : vector<16x128xf32>
    %c0_18 = arith.constant 0 : index
    %c0_19 = arith.constant 0 : index
    %41 = vector.load %arg5[%c0_18, %c0_19] : memref<1x128xf32, #tpu.memory_space<vmem>>, vector<1x128xf32>
    %42 = vector.broadcast %41 : vector<1x128xf32> to vector<16x128xf32>
    %43 = arith.addf %40, %42 : vector<16x128xf32>
    %44 = arith.mulf %43, %43 : vector<16x128xf32>
    %cst_20 = arith.constant dense<0.000000e+00> : vector<16xf32>
    %45 = vector.multi_reduction <add>, %44, %cst_20 [1] : vector<16x128xf32> to vector<16xf32>
    %46 = vector.shape_cast %45 : vector<16xf32> to vector<16x1xf32>
    %cst_21 = arith.constant 9.99999996E-13 : f32
    %47 = vector.broadcast %cst_21 : f32 to vector<16x1xf32>
    %48 = arith.addf %46, %47 : vector<16x1xf32>
    %49 = math.rsqrt %48 : vector<16x1xf32>
    %50 = vector.broadcast %49 : vector<16x1xf32> to vector<16x128xf32>
    %51 = arith.mulf %43, %50 : vector<16x128xf32>
    %c0_22 = arith.constant 0 : index
    %c0_23 = arith.constant 0 : index
    %52 = vector.load %arg6[%c0_22, %c0_23] : memref<16x128xf32, #tpu.memory_space<vmem>>, vector<16x128xf32>
    tpu.vector_store %arg6[%c0_22, %c0_23], %51 {strides = array<i32>} : memref<16x128xf32, #tpu.memory_space<vmem>>, vector<16x128xf32>,
    return
  }
  func.func @transform_0(%arg0: i32) -> (i32, i32) {
    %c0_i32 = arith.constant 0 : i32
    %c0_i32_0 = arith.constant 0 : i32
    return %arg0, %c0_i32 : i32, i32
  }
  func.func @transform_1(%arg0: i32) -> (i32, i32) {
    %c0_i32 = arith.constant 0 : i32
    %c0_i32_0 = arith.constant 0 : i32
    %c0_i32_1 = arith.constant 0 : i32
    return %c0_i32, %c0_i32_0 : i32, i32
  }
  func.func @transform_2(%arg0: i32) -> (i32, i32) {
    %c0_i32 = arith.constant 0 : i32
    %c0_i32_0 = arith.constant 0 : i32
    %c0_i32_1 = arith.constant 0 : i32
    return %c0_i32, %c0_i32_0 : i32, i32
  }
  func.func @transform_3(%arg0: i32) -> (i32, i32) {
    %c0_i32 = arith.constant 0 : i32
    %c0_i32_0 = arith.constant 0 : i32
    %c0_i32_1 = arith.constant 0 : i32
    return %c0_i32, %c0_i32_0 : i32, i32
  }
  func.func @transform_4(%arg0: i32) -> (i32, i32) {
    %c0_i32 = arith.constant 0 : i32
    %c0_i32_0 = arith.constant 0 : i32
    %c0_i32_1 = arith.constant 0 : i32
    return %c0_i32, %c0_i32_0 : i32, i32
  }
  func.func @transform_5(%arg0: i32) -> (i32, i32) {
    %c0_i32 = arith.constant 0 : i32
    %c0_i32_0 = arith.constant 0 : i32
    return %arg0, %c0_i32 : i32, i32
  }
}

</mosaic_0001>

<bundles_post_ra>
// kernel: text_encoder_forward.1
= control target key start
LH: loop header
LB: loop body
LE: loop exit
PB: predicated region body
PF: predicated region fallthrough
CT: control target
= control target key end

     0   :  { %10 = vsyncpa [#allocation4], 0  ;;  %s1113_s0 = inlined_call_operand.vmem [shape: f32[32,1024], index: 0, kind: input, shape index: {}]   ;;  %s1114_s1 = inlined_call_operand.vmem [shape: bf16[128,128], index: 1, kind: input, shape index: {}]   ;;  %s1115_s2 = inlined_call_operand.vmem [shape: bf16[128,128], index: 2, kind: input, shape index: {}]   ;;  %s1116_s3 = inlined_call_operand.vmem [shape: f32[1,128], index: 3, kind: input, shape index: {}]   ;;  %s1117_s4 = inlined_call_operand.vmem [shape: f32[1,128], index: 4, kind: input, shape index: {}]   ;;  %s1118_s5 = inlined_call_operand.hbm [shape: f32[32,128], index: 5, kind: output, shape index: {}]  }
   0x1   :  { %12 = vsyncpa [#allocation4 + $0x1], 0  ;;  %s941_s18 = smov 0   ;;  %s943_s19 = smov 0  }
   0x2   :  { %s945_s20 = smov 0   ;;  %s947_s21 = smov 0  }
   0x3 LB: > { %s689_s22 = sadd.s32 4294967295, %s907_s21   ;;  %s690_s23 = sadd.s32 4294967294, %s907_s21   ;;  %s907_s21 = sphi %s947_s21, %s1124_s21   ;;  %s903_s20 = sphi %s945_s20, %s1123_s20   ;;  %s899_s19 = sphi %s943_s19, %s1122_s19   ;;  %s895_s18 = sphi %s941_s18, %s1121_s18  }
   0x4   : > { %s964_s24 = sadd.s32 1, %s907_s21   ;;  %s25_s25 = sadd.s32 1, %s903_s20 }
   0x5   : > { %s22_s26 = ssub.s32 %s907_s21, %s964_s24  ;;  %p32_p0 = scmp.ne.s32.totalorder %s903_s20, %s899_s19 }
   0x6   : > { %p23_p1 = scmp.eq.s32.totalorder %s22_s26, 0  ;;  %p33_p2 = scmp.eq.s32.totalorder %s907_s21, 0 }
   0x7   : > { %p146_p3 = scmp.eq.s32.totalorder %s689_s22, 1  ;;  %p151_p4 = scmp.ne.s32.totalorder %s899_s19, %s895_s18 }
   0x8   : > { %s977_s27 = scalar_select %p23_p1, %s903_s20, %s25_s25  }
   0x9   : > { %p34_p5 = por %p33_p2, %p32_p0  ;;  %p979_p6 = por %p146_p3, %p32_p0 }
   0xa   : > { %p152_p7 = scmp.eq.s32.totalorder %s690_s23, 1  ;;  %p692_p9 = scmp.ge.s32.totalorder %s907_s21, 2 }
   0xc   : > { %p983_p8 = por %p152_p7, %p151_p4  ;;  %180 = sbr.rel (%p692_p9) target bundleno = 23 (0x17), region = 32 }
  0x11   : > { %183 = sbr.rel (!%p34_p5) target bundleno = 23 (0x17), region = 36  ;;  %s185_s30 = sand.u32 (%p34_p5), 1, %s903_s20  }
  0x12   : > { %s772_s6 = sshll.u32 (%p34_p5), %s907_s21, 7  ;;  %s693_s7 = sshll.u32 (%p34_p5), %s185_s30, 4 }
  0x13   : > { %s191_s10 = scalar_lea.vmem (%p34_p5), %s1113_s0, %s772_s6  ;;  %s187_s11 = scalar_lea.vmem (%p34_p5), [#allocation2], %s693_s7 }
  0x14   : > { %v222_v0 = vld [vmem:[%s191_s10] sm:$0xff] (%p34_p5) }
  0x15   : > { %v224_v1 = vld [vmem:[%s191_s10 + $0x40] sm:$0xff] (%p34_p5)  ;;  %223 = vst [vmem:[%s187_s11] sm:$0xff] (%p34_p5), %v222_v0 }
  0x16   : > { %225 = vst [vmem:[%s187_s11 + $0x8] sm:$0xff] %v224_v1 }
  0x17 PF: > { %p697_p10 = scmp.ge.s32.totalorder %s907_s21, 1  ;;  %p230_p11 = scmp.lt.s32.totalorder %s907_s21, 3 }
  0x19   : > { %p231_p12 = pnand %p697_p10, %p230_p11 }
  0x1a   : > { %s237_s6 = sand.u32 (!%p231_p12), 1, %s899_s19   ;;  %s789_s30 = sshll.u32 (!%p231_p12), %s689_s22, 4 }
  0x1b   : > { %234 = sbr.rel (%p231_p12) target bundleno = 681 (0x2a9), region = 74  ;;  %s1018_s9 = sshll.u32 (!%p231_p12), %s237_s6, 4 }
  0x1c   : > { %s239_s14 = scalar_lea.vmem (!%p231_p12), [#allocation2], %s1018_s9  ;;  %s263_s7 = scalar_lea.vmem (!%p231_p12), [#allocation3], %s1018_s9 }
  0x1d   : > { %s618_s11 = scalar_lea.hbm (!%p231_p12), %s1118_s5, %s789_s30  ;;  %s619_s12 = sshll.u32 (!%p231_p12), %s263_s7, 4  ;;  %s620_s12 = int_to_ptr.vmem [resolvable:$true] %s619_s12 }
  0x1e   : > { %s621_s13 = sshll.u32 (!%p231_p12), %s618_s11, 4  ;;  %s607_s22 = scalar_lea.sflag (!%p231_p12), [#allocation4], %s237_s6  ;;  %s622_s13 = int_to_ptr.hbm [resolvable:$true] %s621_s13 }
  0x1f   : > { %s859_s9 = sshra.s32 (!%p231_p12), %s622_s13, 4  ;;  %s865_s17 = scalar_lea.hbm (!%p231_p12), %s1118_s5, 32  ;;  %s860_s9 = int_to_ptr.hbm [resolvable:$true] %s859_s9 }
  0x20   : > { %v780_v2 = vld [vmem:[%s1114_s1 + $0x38] sm:$0xff]  ;;  %v779_v3 = vld [vmem:[%s1114_s1 + $0x30] sm:$0xff]  ;;  %v778_v4 = vld [vmem:[%s1114_s1 + $0x28] sm:$0xff]  ;;  %p866_p2 = scmp.lt.s32.totalorder %s860_s9, %s1118_s5 }
  0x21   : > { %333 = vmatpush.bf16.msra.mxu0 %v780_v2  ;;  %v777_v5 = vld [vmem:[%s1114_s1 + $0x20] sm:$0xff]  ;;  %v776_v6 = vld [vmem:[%s1114_s1 + $0x18] sm:$0xff]  ;;  %v775_v7 = vld [vmem:[%s1114_s1 + $0x10] sm:$0xff] }
  0x22   : > { %v774_v8 = vld [vmem:[%s1114_s1 + $0x8] sm:$0xff]  ;;  %v773_v9 = vld [vmem:[%s1114_s1] sm:$0xff]  ;;  %v788_v13 = vld [vmem:[%s1115_s2 + $0x38] sm:$0xff] }
  0x23   : > { %v266_v10 = vld [vmem:[%s239_s14] sm:$0xff]  ;;  %v267_v11 = vld [vmem:[%s239_s14 + $0x8] sm:$0xff]  ;;  %500 = vmatpush.bf16.msra.mxu1 %v788_v13  ;;  %s861_s14 = scalar_lea.hbm %s860_s9, 16 }
  0x24   : > { %v268_v12 = vpack.c.bf16 %v267_v11, %v266_v10  ;;  %v787_v16 = vld [vmem:[%s1115_s2 + $0x30] sm:$0xff]  ;;  %v786_v19 = vld [vmem:[%s1115_s2 + $0x28] sm:$0xff]  ;;  %v785_v25 = vld [vmem:[%s1115_s2 + $0x20] sm:$0xff]  ;;  %p862_p13 = scmp.ne.s32.totalorder %s860_s9, %s861_s14  ;;  %p867_p3 = scmp.lt.s32.totalorder %s865_s17, %s861_s14 }
  0x25   : > { %334 = vmatpush.bf16.msra.mxu0 %v779_v3  ;;  %v784_v31 = vld [vmem:[%s1115_s2 + $0x18] sm:$0xff]  ;;  %v783_v39 = vld [vmem:[%s1115_s2 + $0x10] sm:$0xff]  ;;  %v782_v44 = vld [vmem:[%s1115_s2 + $0x8] sm:$0xff] }
  0x26   : > { %v781_v51 = vld [vmem:[%s1115_s2] sm:$0xff]  ;;  %p863_p0 = pnand %p862_p13, %p979_p6  ;;  %p868_p4 = por %p867_p3, %p866_p2 }
  0x27   : > { %501 = vmatpush.bf16.msra.mxu1 %v787_v16 }
  0x28   : > { %p864_p1 = pneg %p863_p0 }
  0x29   : > { %335 = vmatpush.bf16.msra.mxu0 %v778_v4 }
  0x2a   : > { %p869_p5 = pnand %p868_p4, %p864_p1 }
  0x2b   : > { %502 = vmatpush.bf16.msra.mxu1 %v786_v19 }
  0x2d   : > { %336 = vmatpush.bf16.msra.mxu0 %v777_v5 }
  0x2f   : > { %503 = vmatpush.bf16.msra.mxu1 %v785_v25 }
  0x31   : > { %337 = vmatpush.bf16.msra.mxu0 %v776_v6 }
  0x33   : > { %504 = vmatpush.bf16.msra.mxu1 %v784_v31 }
  0x35   : > { %338 = vmatpush.bf16.msra.mxu0 %v775_v7 }
  0x37   : > { %505 = vmatpush.bf16.msra.mxu1 %v783_v39 }
  0x39   : > { %339 = vmatpush.bf16.msra.mxu0 %v774_v8 }
  0x3b   : > { %506 = vmatpush.bf16.msra.mxu1 %v782_v44 }
  0x3d   : > { %340 = vmatpush.bf16.msra.mxu0 %v773_v9 }
  0x3f   : > { %507 = vmatpush.bf16.msra.mxu1 %v781_v51 }
  0x40   : > { %341 = vmatmul.bf16.vlgmr.msra.gmra.mxu0 %v268_v12 }
  0xbd   : > { %v1030_v14 = vpop.f32.mrf.mxu0 }
  0xbe   : > { %v1033_v15 = vmul.f32 0.70710677, %v1030_v14 }
  0xc0   : > { %v351_v17 = vmul.f32 %v1033_v15, %v1033_v15 }
  0xc2   : > { %v352_v18 = vmin.f32 %v351_v17, 16.0 }
  0xc4   : > { %v353_v20 = vmul.f32 2.1237322e-06, %v352_v18  ;;  %v364_v21 = vmul.f32 3.8918573e-05, %v352_v18 }
  0xc5   : > { %v1043_v22 = vpop.f32.mrf.mxu0 }
  0xc6   : > { %v354_v23 = vadd.f32 0.00028619796, %v353_v20  ;;  %v1046_v24 = vmul.f32 0.70710677, %v1043_v22  ;;  %v365_v26 = vadd.f32 0.001143296, %v364_v21 }
  0xc8   : > { %v391_v27 = vmul.f32 %v1046_v24, %v1046_v24  ;;  %v355_v28 = vmul.f32 %v354_v23, %v352_v18  ;;  %v366_v29 = vmul.f32 %v365_v26, %v352_v18 }
  0xca   : > { %v392_v30 = vmin.f32 %v391_v27, 16.0  ;;  %v367_v32 = vadd.f32 0.014752088, %v366_v29  ;;  %v356_v35 = vadd.f32 0.0036580483, %v355_v28 }
  0xcc   : > { %v393_v33 = vmul.f32 2.1237322e-06, %v392_v30  ;;  %v404_v34 = vmul.f32 3.8918573e-05, %v392_v30  ;;  %v368_v36 = vmul.f32 %v367_v32, %v352_v18  ;;  %v357_v43 = vmul.f32 %v356_v35, %v352_v18 }
  0xcd   : > { %v347_v35 = vmul.f32 0.5, %v1030_v14 }
  0xce   : > { %v394_v37 = vadd.f32 0.00028619796, %v393_v33  ;;  %v405_v38 = vadd.f32 0.001143296, %v404_v34  ;;  %v369_v40 = vadd.f32 0.112945676, %v368_v36 }
  0xcf   : > { %v358_v50 = vadd.f32 0.05243302, %v357_v43  ;;  %v348_v36 = vmul.f32 0.5, %v1043_v22 }
  0xd0   : > { %v395_v41 = vmul.f32 %v394_v37, %v392_v30  ;;  %v406_v42 = vmul.f32 %v405_v38, %v392_v30  ;;  %v370_v45 = vmul.f32 %v369_v40, %v352_v18 }
  0xd1   : > { %v359_v57 = vmul.f32 %v358_v50, %v352_v18 }
  0xd2   : > { %v396_v46 = vadd.f32 0.0036580483, %v395_v41  ;;  %v407_v47 = vadd.f32 0.014752088, %v406_v42  ;;  %v371_v48 = vadd.f32 0.4994258, %v370_v45 }
  0xd3   : > { %v360_v61 = vadd.f32 0.18741608, %v359_v57 }
  0xd4   : > { %v408_v49 = vmul.f32 %v407_v47, %v392_v30  ;;  %v372_v52 = vmul.f32 %v371_v48, %v352_v18  ;;  %v397_v53 = vmul.f32 %v396_v46, %v392_v30 }
  0xd5   : > { %v361_v1 = vmul.f32 %v360_v61, %v352_v18 }
  0xd6   : > { %v409_v54 = vadd.f32 0.112945676, %v408_v49  ;;  %v373_v55 = vadd.f32 1.0, %v372_v52  ;;  %v398_v58 = vadd.f32 0.05243302, %v397_v53 }
  0xd7   : > { %v362_v6 = vadd.f32 1.1283791, %v361_v1 }
  0xd8   : > { %v410_v56 = vmul.f32 %v409_v54, %v392_v30  ;;  %833 = vrcp.f32 %v373_v55  ;;  %v399_v62 = vmul.f32 %v398_v58, %v392_v30  ;;  %v385_v5 = vand.u32 2147483648, %v373_v55 }
  0xd9   : > { %v383_v8 = vand.u32 2147483647, %v373_v55  ;;  %vm379_vm1 = vweird.f32 %v373_v55  ;;  %v363_v16 = vmul.f32 %v362_v6, %v1033_v15 }
  0xda   : > { %v411_v59 = vadd.f32 0.4994258, %v410_v56  ;;  %v400_v3 = vadd.f32 0.18741608, %v399_v62  ;;  %v386_v13 = vor.u32 1.1754944e-38, %v385_v5 }
  0xdb   : > { %vm384_vm3 = vcmp.eq.f32.partialorder %v383_v8, 8.507059e+37  ;;  %v831_v5 = vld [vmem:[%s1116_s3] ss:$0 sm:$0xff] }
  0xdc   : > { %v412_v60 = vmul.f32 %v411_v59, %v392_v30  ;;  %v401_v10 = vmul.f32 %v400_v3, %v392_v30 }
  0xde   : > { %v413_v63 = vadd.f32 1.0, %v412_v60  ;;  %v834_v0 = vpop.eup %833  ;;  %v402_v18 = vadd.f32 1.1283791, %v401_v10 }
  0xdf   : > { %v375_v2 = vmul.f32 %v834_v0, %v373_v55  ;;  %vm380_vm0 = vweird.f32 %v834_v0 }
  0xe0   : > { %835 = vrcp.f32 %v413_v63  ;;  %vm381_vm2 = vmor %vm379_vm1, %vm380_vm0  ;;  %v425_v20 = vand.u32 2147483648, %v413_v63  ;;  %v423_v25 = vand.u32 2147483647, %v413_v63  ;;  %vm419_vm5 = vweird.f32 %v413_v63 }
  0xe1   : > { %v376_v4 = vsub.f32 1.0, %v375_v2  ;;  %v403_v29 = vmul.f32 %v402_v18, %v1046_v24 }
  0xe2   : > { %v426_v28 = vor.u32 1.1754944e-38, %v425_v20  ;;  %vm424_vm7 = vcmp.eq.f32.partialorder %v423_v25, 8.507059e+37 }
  0xe3   : > { %v377_v7 = vmul.f32 %v834_v0, %v376_v4 }
  0xe5   : > { %v378_v12 = vadd.f32 %v834_v0, %v377_v7 }
  0xe6   : > { %v836_v9 = vpop.eup %835 }
  0xe7   : > { %v415_v11 = vmul.f32 %v836_v9, %v413_v63  ;;  %v382_v19 = vsel %vm381_vm2, %v834_v0, %v378_v12  ;;  %vm420_vm4 = vweird.f32 %v836_v9 }
  0xe8   : > { %v387_v21 = vsel %vm384_vm3, %v386_v13, %v382_v19  ;;  %vm421_vm6 = vmor %vm419_vm5, %vm420_vm4 }
  0xe9   : > { %v416_v17 = vsub.f32 1.0, %v415_v11  ;;  %v388_v26 = vmul.f32 %v387_v21, %v363_v16 }
  0xeb   : > { %v417_v23 = vmul.f32 %v836_v9, %v416_v17  ;;  %v732_v31 = vclamps-f32 %v388_v26, 1.0 }
  0xed   : > { %v418_v27 = vadd.f32 %v836_v9, %v417_v23  ;;  %v431_v34 = vadd.f32 1.0, %v732_v31 }
  0xef   : > { %v422_v30 = vsel %vm421_vm6, %v836_v9, %v418_v27  ;;  %v433_v38 = vmul.f32 %v431_v34, %v347_v35  ;;  %v832_v9 = vld [vmem:[%s1117_s4] ss:$0 sm:$0xff] }
  0xf0   : > { %v427_v15 = vsel %vm424_vm7, %v426_v28, %v422_v30 }
  0xf1   : > { %v428_v32 = vmul.f32 %v427_v15, %v403_v29 }
  0xf3   : > { %v733_v33 = vclamps-f32 %v428_v32, 1.0 }
  0xf5   : > { %v432_v37 = vadd.f32 1.0, %v733_v33 }
  0xf7   : > { %v434_v39 = vmul.f32 %v432_v37, %v348_v36 }
  0xf9   : > { %v435_v40 = vpack.c.bf16 %v434_v39, %v433_v38 }
  0xfb   : > { %508 = vmatmul.bf16.vlgmr.msra.gmra.mxu1 %v435_v40 }
 0x178   : > { %v509_v41 = vpop.f32.mrf.mxu1 }
 0x179   : > { %v514_v42 = vadd.f32 %v509_v41, %v1030_v14 }
 0x17b   : > { %516 = vadd.xlane.f32.xlu0 %v514_v42  ;;  %v522_v24 = vmul.f32 %v514_v42, %v514_v42 }
 0x17d   : > { %524 = vadd.xlane.f32.xlu1 %v522_v24 }
 0x180   : > { %v511_v43 = vpop.f32.mrf.mxu1 }
 0x181   : > { %v515_v44 = vadd.f32 %v511_v43, %v1043_v22 }
 0x183   : > { %518 = vadd.xlane.f32.xlu0 %v515_v44  ;;  %v523_v45 = vmul.f32 %v515_v44, %v515_v44 }
 0x185   : > { %526 = vadd.xlane.f32.xlu1 %v523_v45 }
 0x1ee   : > { %v517_v46 = vpop.xlane.xlu0 %516 }
 0x1ef   : > { %v520_v47 = vmul.f32 0.0078125, %v517_v46 }
 0x1f0   : > { %v525_v48 = vpop.xlane.xlu1 %524 }
 0x1f1   : > { %v530_v49 = vmul.f32 %v520_v47, %v520_v47  ;;  %v528_v50 = vmul.f32 0.0078125, %v525_v48  ;;  %v536_v3 = vsub.f32 %v514_v42, %v520_v47 }
 0x1f3   : > { %v532_v51 = vsub.f32 %v528_v50, %v530_v49 }
 0x1f5   : > { %v534_v52 = vmax.f32 %v532_v51, 0.0 }
 0x1f6   : > { %v519_v53 = vpop.xlane.xlu0 %518 }
 0x1f7   : > { %v538_v54 = vadd.f32 1e-05, %v534_v52  ;;  %v521_v55 = vmul.f32 0.0078125, %v519_v53 }
 0x1f8   : > { %v527_v14 = vpop.xlane.xlu1 %526 }
 0x1f9   : > { %837 = vrsqrt.f32 %v538_v54  ;;  %v531_v56 = vmul.f32 %v521_v55, %v521_v55  ;;  %v529_v57 = vmul.f32 0.0078125, %v527_v14  ;;  %vm546_vm9 = vweird.f32 %v538_v54 }
 0x1fa   : > { %v537_v19 = vsub.f32 %v515_v44, %v521_v55 }
 0x1fb   : > { %v533_v58 = vsub.f32 %v529_v57, %v531_v56 }
 0x1fd   : > { %v535_v59 = vmax.f32 %v533_v58, 0.0 }
 0x1ff   : > { %v838_v22 = vpop.eup %837  ;;  %v539_v61 = vadd.f32 1e-05, %v535_v59 }
 0x200   : > { %v541_v60 = vmul.f32 %v838_v22, %v538_v54  ;;  %vm547_vm8 = vweird.f32 %v838_v22 }
 0x201   : > { %839 = vrsqrt.f32 %v539_v61  ;;  %vm548_vm10 = vmor %vm546_vm9, %vm547_vm8  ;;  %vm556_vm12 = vweird.f32 %v539_v61 }
 0x202   : > { %v542_v62 = vmul.f32 %v838_v22, %v541_v60 }
 0x204   : > { %v543_v63 = vmul.f32 0.5, %v542_v62 }
 0x206   : > { %v544_v0 = vsub.f32 1.5, %v543_v63 }
 0x207   : > { %v840_v1 = vpop.eup %839 }
 0x208   : > { %v545_v2 = vmul.f32 %v838_v22, %v544_v0  ;;  %v551_v4 = vmul.f32 %v840_v1, %v539_v61  ;;  %vm557_vm11 = vweird.f32 %v840_v1 }
 0x209   : > { %vm558_vm13 = vmor %vm556_vm12, %vm557_vm11 }
 0x20a   : > { %v549_v6 = vsel %vm548_vm10, %v838_v22, %v545_v2  ;;  %v552_v7 = vmul.f32 %v840_v1, %v551_v4 }
 0x20b   : > { %v560_v8 = vmul.f32 %v549_v6, %v536_v3 }
 0x20c   : > { %v553_v10 = vmul.f32 0.5, %v552_v7 }
 0x20d   : > { %v566_v11 = vmul.f32 %v831_v5, %v560_v8 }
 0x20e   : > { %v554_v12 = vsub.f32 1.5, %v553_v10 }
 0x20f   : > { %v572_v13 = vadd.f32 %v832_v9, %v566_v11 }
 0x210   : > { %v555_v16 = vmul.f32 %v840_v1, %v554_v12 }
 0x211   : > { %v574_v17 = vmul.f32 %v572_v13, %v572_v13 }
 0x212   : > { %v559_v18 = vsel %vm558_vm13, %v840_v1, %v555_v16 }
 0x213   : > { %576 = vadd.xlane.f32.xlu2 %v574_v17  ;;  %v561_v20 = vmul.f32 %v559_v18, %v537_v19 }
 0x215   : > { %v567_v21 = vmul.f32 %v831_v5, %v561_v20 }
 0x217   : > { %v573_v23 = vadd.f32 %v832_v9, %v567_v21 }
 0x219   : > { %v575_v25 = vmul.f32 %v573_v23, %v573_v23 }
 0x21b   : > { %578 = vadd.xlane.f32.xlu2 %v575_v25 }
 0x286   : > { %v577_v26 = vpop.xlane.xlu2 %576 }
 0x287   : > { %v580_v27 = vadd.f32 1e-12, %v577_v26 }
 0x289   : > { %841 = vrsqrt.f32 %v580_v27  ;;  %vm588_vm15 = vweird.f32 %v580_v27 }
 0x28e   : > { %v579_v29 = vpop.xlane.xlu2 %578 }
 0x28f   : > { %v842_v28 = vpop.eup %841  ;;  %v581_v31 = vadd.f32 1e-12, %v579_v29 }
 0x290   : > { %v583_v30 = vmul.f32 %v842_v28, %v580_v27  ;;  %vm589_vm14 = vweird.f32 %v842_v28 }
 0x291   : > { %843 = vrsqrt.f32 %v581_v31  ;;  %vm590_vm0 = vmor %vm588_vm15, %vm589_vm14  ;;  %vm598_vm2 = vweird.f32 %v581_v31 }
 0x292   : > { %v584_v15 = vmul.f32 %v842_v28, %v583_v30 }
 0x294   : > { %v585_v32 = vmul.f32 0.5, %v584_v15 }
 0x296   : > { %v586_v33 = vsub.f32 1.5, %v585_v32 }
 0x297   : > { %v844_v34 = vpop.eup %843 }
 0x298   : > { %v587_v35 = vmul.f32 %v842_v28, %v586_v33  ;;  %v593_v36 = vmul.f32 %v844_v34, %v581_v31  ;;  %vm599_vm1 = vweird.f32 %v844_v34 }
 0x299   : > { %vm600_vm3 = vmor %vm598_vm2, %vm599_vm1 }
 0x29a   : > { %v591_v37 = vsel %vm590_vm0, %v842_v28, %v587_v35  ;;  %v594_v39 = vmul.f32 %v844_v34, %v593_v36 }
 0x29b   : > { %v602_v38 = vmul.f32 %v591_v37, %v572_v13 }
 0x29c   : > { %v595_v40 = vmul.f32 0.5, %v594_v39 }
 0x29d   : > { %604 = vst [vmem:[%s263_s7] sm:$0xff] %v602_v38 }
 0x29e   : > { %v596_v41 = vsub.f32 1.5, %v595_v40 }
 0x2a0   : > { %v597_v42 = vmul.f32 %v844_v34, %v596_v41 }
 0x2a2   : > { %v601_v24 = vsel %vm600_vm3, %v844_v34, %v597_v42 }
 0x2a3   : > { %v603_v43 = vmul.f32 %v601_v24, %v573_v23 }
 0x2a5   : > { %605 = vst [vmem:[%s263_s7 + $0x8] sm:$0xff] %v603_v43 }
 0x2a6   : > { %872 = shalt.err (!%p869_p5)
}
 0x2a7   : > { %s909_s6 = smov 128   ;;  %s910_s26 = smov 8  }
 0x2a8   : > { %790 = dma.vmem_to_hbm [thread:$0]  (%p979_p6), %s620_s12, 256, %s622_s13, %s607_s22, %s909_s6, %s909_s6, %s910_s26  }
 0x2a9 PF: > { %s636_s30 = sand.u32 1, %s895_s18   ;;  %p793_p7 = pnand %p692_p9, %p983_p8 }
 0x2aa   : > { %s637_s7 = scalar_lea.sflag [#allocation4], %s636_s30 }
 0x2ab   : > { %p794_p10 = pneg %p793_p7 }
 0x2ad   : > { %890 = dma.done.wait (%p794_p10), %s637_s7, 256  }
 0x2ae   : > { %892 = vsyncadd (%p794_p10), %s637_s7, 4294967040  ;;  %p15_p11 = scmp.ge.s32.totalorder %s964_s24, 4   ;;  %s1121_s18 = smov %s899_s19 }
 0x2af   : > { %s1122_s19 = smov %s903_s20  ;;  %s1123_s20 = smov %s977_s27 }
 0x2b0   : > { %s1124_s21 = smov %s964_s24  ;;  %17 = sbr.rel (!%p15_p11) target bundleno = 3 (0x3), region = 118 }
 0x2b5   :  { %643 = vsyncpa [#allocation4], 1 }
 0x2b6   :  { %645 = vsyncpa [#allocation4 + $0x1], 1 }

</bundles_post_ra>
